<compile_context>
chip_gen: v7x
topology: tpu7x:2x2x1
jax: 0.10.0
libtpu: 0.0.40
codegen_flags: <defaults>
</compile_context>

<pallas_src>
import functools

import jax
import jax.numpy as jnp
from jax.experimental import pallas as pl
from jax.experimental.pallas import tpu as pltpu


def _round_up(x, m):
    return pl.cdiv(x, m) * m


# ---------------------------------------------------------------------------
# Fused per-image kernel:  out_wide[n] = sum_taps W_tap @ shifted(x_slab) + b
# ---------------------------------------------------------------------------
def _make_snconv_kernel(taps, c_rows, mw):
    """taps: tuple of (row_start, lane_offset) static ints, one per (kh, kw),
    ordered to match the leading axis of the (T, OC, c_rows) weight.
    c_rows: padded channel rows contracted per tap.  mw: wide output lanes
    (multiple of 128 -> lane-dense stores)."""

    def kernel(w_ref, b_ref, x_ref, o_ref):
        # w_ref: (T, OC, c_rows) bf16   b_ref: (OC, 1) f32
        # x_ref: (R, S_pad)      bf16   o_ref: (OC, mw) f32
        acc = None
        for t, (row0, off) in enumerate(taps):           # KH*KW, unrolled
            x_win = x_ref[pl.ds(row0, c_rows), pl.ds(off, mw)]     # (c_rows, mw)
            part = jnp.dot(w_ref[t], x_win,
                           preferred_element_type=jnp.float32)      # (OC, mw) f32
            acc = part if acc is None else acc + part
        o_ref[...] = acc + b_ref[...]                     # bias broadcast over lanes

    return kernel


# ---------------------------------------------------------------------------
# SNConv2d forward (spectral_norm pre-forward hook + fused conv2d)
# ---------------------------------------------------------------------------
def sn_conv2d_forward(x, weight, bias, u, *, stride=1, padding=0, eps=1e-12,
                      mxu_dtype=jnp.bfloat16):
    """x: (N, C, H, W) f32. weight: (OC, C, KH, KW). bias: (OC,). u: (OC,).

    Returns (out NCHW, sigma, u_new) — u_new is the updated power-iteration
    buffer (PyTorch's spectral_norm updates `u` in place in training mode)."""
    N, C, H, W = x.shape
    OC, _, KH, KW = weight.shape
    s = stride

    # --- spectral norm: one power iteration (training-mode default) ---------
    # Matches torch.nn.utils.spectral_norm: v=normalize(W^T u), u=normalize(Wv),
    # sigma = u . (W v)  computed with the *updated* u.
    w_mat = weight.reshape(OC, -1)                       # (OC, C*KH*KW)
    v = w_mat.T @ u
    v = v / jnp.maximum(jnp.linalg.norm(v), eps)
    u_new = w_mat @ v
    u_new = u_new / jnp.maximum(jnp.linalg.norm(u_new), eps)
    sigma = u_new @ (w_mat @ v)
    inv_sigma = 1.0 / sigma

    # --- geometry ------------------------------------------------------------
    H_pad, W_pad = H + 2 * padding, W + 2 * padding
    OH = (H_pad - KH) // s + 1
    OW = (W_pad - KW) // s + 1
    Hq, Wq = -(-H_pad // s), -(-W_pad // s)              # per-phase extents (ceil)
    C_pad = max(8, _round_up(C, 8))                      # sublane-aligned contraction
    MW = _round_up(OH * Wq, 128)                         # lane-dense wide output
    max_off = ((KH - 1) // s) * Wq + (KW - 1) // s       # largest tap lane offset
    S_pad = _round_up(max(Hq * Wq, MW + max_off), 128)   # keeps every tap slice in-bounds
    R = s * s * C_pad                                    # rows of the per-image slab

    # --- input slab: (N, phase-major/channel-minor rows, flat padded HW) -----
    # Total bytes ~= original input (bf16) — no 9x im2col blow-up.
    x_p = jnp.pad(x, ((0, 0), (0, 0),
                      (padding, padding + Hq * s - H_pad),
                      (padding, padding + Wq * s - W_pad)))
    x_poly = (x_p.reshape(N, C, Hq, s, Wq, s)
              .transpose(0, 3, 5, 1, 2, 4))              # (N, rh, rw, C, Hq, Wq)
    x_poly = jnp.pad(x_poly, ((0, 0), (0, 0), (0, 0),
                              (0, C_pad - C), (0, 0), (0, 0)))
    x_rows = x_poly.reshape(N, R, Hq * Wq)
    x_rows = jnp.pad(x_rows, ((0, 0), (0, 0), (0, S_pad - Hq * Wq)))
    x_rows = x_rows.astype(mxu_dtype)

    # --- per-tap weights (1/sigma folded into the tiny weight) ---------------
    w_sn = weight * inv_sigma                             # (OC, C, KH, KW)
    w_taps = jnp.pad(w_sn.transpose(2, 3, 0, 1),          # (KH, KW, OC, C)
                     ((0, 0), (0, 0), (0, 0), (0, C_pad - C)))
    w_taps = w_taps.reshape(KH * KW, OC, C_pad).astype(mxu_dtype)
    bias_col = bias.reshape(OC, 1).astype(jnp.float32)

    # Static (row_start, lane_offset) per tap; order matches w_taps leading axis.
    taps = []
    for kh in range(KH):
        for kw in range(KW):
            phase = (kh % s) * s + (kw % s)
            taps.append((phase * C_pad, (kh // s) * Wq + (kw // s)))
    taps = tuple(taps)

    kernel = _make_snconv_kernel(taps, C_pad, MW)

    out_wide = pl.pallas_call(
        kernel,
        out_shape=jax.ShapeDtypeStruct((N, OC, MW), jnp.float32),
        grid_spec=pltpu.PrefetchScalarGridSpec(
            num_scalar_prefetch=0,
            grid=(N,),                                    # one image per step
            in_specs=[
                pl.BlockSpec((KH * KW, OC, C_pad), lambda n: (0, 0, 0)),  # weights
                pl.BlockSpec((OC, 1), lambda n: (0, 0)),                  # bias
                pl.BlockSpec((None, R, S_pad), lambda n: (n, 0, 0)),      # image slab
            ],
            out_specs=pl.BlockSpec((None, OC, MW), lambda n: (n, 0, 0)),
        ),
        compiler_params=pltpu.CompilerParams(
            dimension_semantics=("parallel",),            # shards images on v7x TCs
            vmem_limit_bytes=64 * 1024 * 1024),
    )(w_taps, bias_col, x_rows)

    # Wide -> NCHW: metadata-only reshape + one small crop (the ow >= OW lanes
    # are the garbage positions of the shift trick).  No transpose pass.
    out = out_wide[:, :, :OH * Wq].reshape(N, OC, OH, Wq)[:, :, :, :OW]
    return out, sigma, u_new


# ---------------------------------------------------------------------------
# Reference (plain JAX, f32) for a sanity check
# ---------------------------------------------------------------------------
def _reference(x, weight, bias, sigma, *, stride, padding):
    w_sn = weight / sigma
    out = jax.lax.conv_general_dilated(
        x, w_sn, window_strides=(stride, stride),
        padding=[(padding, padding), (padding, padding)],
        dimension_numbers=("NCHW", "OIHW", "NCHW"))
    return out + bias.reshape(1, -1, 1, 1)


if __name__ == "__main__":
    # Module config: SNConv2d(in_channels=4, out_channels=8, kernel_size=3,
    #                         stride=1, padding=1)
    N, C, H, W = 2, 4, 16, 16
    OC, KH, KW = 8, 3, 3
    stride, padding = 1, 1

    key = jax.random.PRNGKey(0)
    kx, kw_, kb, ku = jax.random.split(key, 4)

    x = jax.random.normal(kx, (N, C, H, W), dtype=jnp.float32)
    weight = 0.1 * jax.random.normal(kw_, (OC, C, KH, KW), dtype=jnp.float32)
    bias = 0.1 * jax.random.normal(kb, (OC,), dtype=jnp.float32)
    # spectral_norm buffer u: normalize(randn(OC))
    u0 = jax.random.normal(ku, (OC,), dtype=jnp.float32)
    u0 = u0 / jnp.maximum(jnp.linalg.norm(u0), 1e-12)

    fwd = jax.jit(functools.partial(sn_conv2d_forward,
                                    stride=stride, padding=padding))
    out, sigma, u_new = fwd(x, weight, bias, u0)
    out = jax.block_until_ready(out)

    ref = _reference(x, weight, bias, sigma, stride=stride, padding=padding)
    assert out.shape == (N, OC, H, W)
    assert bool(jnp.isfinite(sigma)) and float(sigma) > 0.0
    # Tolerance accounts for bf16 MXU operands (f32 accumulation).
    assert jnp.allclose(out, ref, atol=5e-2, rtol=5e-2), "mismatch vs reference"

    print("KERNEL_OK")
</pallas_src>

<mosaic_0001>
module attributes {stable_mosaic.version = 11 : i64} {
  func.func @kernel(%arg0: i32, %arg1: memref<9x8x8xbf16, #tpu.memory_space<vmem>>, %arg2: memref<8x1xf32, #tpu.memory_space<vmem>>, %arg3: memref<1x8x512xbf16, #tpu.memory_space<vmem>>, %arg4: memref<1x8x384xf32, #tpu.memory_space<vmem>>) attributes {dimension_semantics = [#tpu.dimension_semantics<parallel>], iteration_bounds = array<i64: 2>, scalar_prefetch = 0 : i64, scratch_operands = 0 : i64, tpu.core_type = #tpu.core_type<tc>, window_params = [{pipeline_mode = #tpu.pipeline_mode<synchronous>, transform_indices = @transform_0, window_bounds = array<i64: 9, 8, 8>}, {pipeline_mode = #tpu.pipeline_mode<synchronous>, transform_indices = @transform_1, window_bounds = array<i64: 8, 1>}, {transform_indices = @transform_2, window_bounds = array<i64: 1, 8, 512>}, {transform_indices = @transform_3, window_bounds = array<i64: 1, 8, 384>}]} {
    %c0 = arith.constant 0 : index
    %c0_0 = arith.constant 0 : index
    %c0_1 = arith.constant 0 : index
    %0 = vector.load %arg3[%c0, %c0_0, %c0_1] : memref<1x8x512xbf16, #tpu.memory_space<vmem>>, vector<1x8x384xbf16>
    %1 = vector.shape_cast %0 : vector<1x8x384xbf16> to vector<8x384xbf16>
    %c0_2 = arith.constant 0 : index
    %c0_3 = arith.constant 0 : index
    %c0_4 = arith.constant 0 : index
    %2 = vector.load %arg1[%c0_2, %c0_3, %c0_4] : memref<9x8x8xbf16, #tpu.memory_space<vmem>>, vector<1x8x8xbf16>
    %3 = vector.shape_cast %2 : vector<1x8x8xbf16> to vector<8x8xbf16>
    %cst = arith.constant dense<0.000000e+00> : vector<8x384xf32>
    %4 = tpu.matmul %3, %1, %cst {dimension_numbers = #tpu.dot_dimension_numbers<[1], [0], [0], [1], [0, 0, 1, 1], [], []>} : vector<8x8xbf16>, vector<8x384xbf16>, vector<8x384xf32> -> vector<8x384xf32>
    %c0_5 = arith.constant 0 : index
    %c0_6 = arith.constant 0 : index
    %c1 = arith.constant 1 : index
    %5 = vector.load %arg3[%c0_5, %c0_6, %c1] : memref<1x8x512xbf16, #tpu.memory_space<vmem>>, vector<1x8x384xbf16>
    %6 = vector.shape_cast %5 : vector<1x8x384xbf16> to vector<8x384xbf16>
    %c1_7 = arith.constant 1 : index
    %c0_8 = arith.constant 0 : index
    %c0_9 = arith.constant 0 : index
    %7 = vector.load %arg1[%c1_7, %c0_8, %c0_9] : memref<9x8x8xbf16, #tpu.memory_space<vmem>>, vector<1x8x8xbf16>
    %8 = vector.shape_cast %7 : vector<1x8x8xbf16> to vector<8x8xbf16>
    %cst_10 = arith.constant dense<0.000000e+00> : vector<8x384xf32>
    %9 = tpu.matmul %8, %6, %cst_10 {dimension_numbers = #tpu.dot_dimension_numbers<[1], [0], [0], [1], [0, 0, 1, 1], [], []>} : vector<8x8xbf16>, vector<8x384xbf16>, vector<8x384xf32> -> vector<8x384xf32>
    %10 = arith.addf %4, %9 : vector<8x384xf32>
    %c0_11 = arith.constant 0 : index
    %c0_12 = arith.constant 0 : index
    %c2 = arith.constant 2 : index
    %11 = vector.load %arg3[%c0_11, %c0_12, %c2] : memref<1x8x512xbf16, #tpu.memory_space<vmem>>, vector<1x8x384xbf16>
    %12 = vector.shape_cast %11 : vector<1x8x384xbf16> to vector<8x384xbf16>
    %c2_13 = arith.constant 2 : index
    %c0_14 = arith.constant 0 : index
    %c0_15 = arith.constant 0 : index
    %13 = vector.load %arg1[%c2_13, %c0_14, %c0_15] : memref<9x8x8xbf16, #tpu.memory_space<vmem>>, vector<1x8x8xbf16>
    %14 = vector.shape_cast %13 : vector<1x8x8xbf16> to vector<8x8xbf16>
    %cst_16 = arith.constant dense<0.000000e+00> : vector<8x384xf32>
    %15 = tpu.matmul %14, %12, %cst_16 {dimension_numbers = #tpu.dot_dimension_numbers<[1], [0], [0], [1], [0, 0, 1, 1], [], []>} : vector<8x8xbf16>, vector<8x384xbf16>, vector<8x384xf32> -> vector<8x384xf32>
    %16 = arith.addf %10, %15 : vector<8x384xf32>
    %c0_17 = arith.constant 0 : index
    %c0_18 = arith.constant 0 : index
    %c18 = arith.constant 18 : index
    %17 = vector.load %arg3[%c0_17, %c0_18, %c18] : memref<1x8x512xbf16, #tpu.memory_space<vmem>>, vector<1x8x384xbf16>
    %18 = vector.shape_cast %17 : vector<1x8x384xbf16> to vector<8x384xbf16>
    %c3 = arith.constant 3 : index
    %c0_19 = arith.constant 0 : index
    %c0_20 = arith.constant 0 : index
    %19 = vector.load %arg1[%c3, %c0_19, %c0_20] : memref<9x8x8xbf16, #tpu.memory_space<vmem>>, vector<1x8x8xbf16>
    %20 = vector.shape_cast %19 : vector<1x8x8xbf16> to vector<8x8xbf16>
    %cst_21 = arith.constant dense<0.000000e+00> : vector<8x384xf32>
    %21 = tpu.matmul %20, %18, %cst_21 {dimension_numbers = #tpu.dot_dimension_numbers<[1], [0], [0], [1], [0, 0, 1, 1], [], []>} : vector<8x8xbf16>, vector<8x384xbf16>, vector<8x384xf32> -> vector<8x384xf32>
    %22 = arith.addf %16, %21 : vector<8x384xf32>
    %c0_22 = arith.constant 0 : index
    %c0_23 = arith.constant 0 : index
    %c19 = arith.constant 19 : index
    %23 = vector.load %arg3[%c0_22, %c0_23, %c19] : memref<1x8x512xbf16, #tpu.memory_space<vmem>>, vector<1x8x384xbf16>
    %24 = vector.shape_cast %23 : vector<1x8x384xbf16> to vector<8x384xbf16>
    %c4 = arith.constant 4 : index
    %c0_24 = arith.constant 0 : index
    %c0_25 = arith.constant 0 : index
    %25 = vector.load %arg1[%c4, %c0_24, %c0_25] : memref<9x8x8xbf16, #tpu.memory_space<vmem>>, vector<1x8x8xbf16>
    %26 = vector.shape_cast %25 : vector<1x8x8xbf16> to vector<8x8xbf16>
    %cst_26 = arith.constant dense<0.000000e+00> : vector<8x384xf32>
    %27 = tpu.matmul %26, %24, %cst_26 {dimension_numbers = #tpu.dot_dimension_numbers<[1], [0], [0], [1], [0, 0, 1, 1], [], []>} : vector<8x8xbf16>, vector<8x384xbf16>, vector<8x384xf32> -> vector<8x384xf32>
    %28 = arith.addf %22, %27 : vector<8x384xf32>
    %c0_27 = arith.constant 0 : index
    %c0_28 = arith.constant 0 : index
    %c20 = arith.constant 20 : index
    %29 = vector.load %arg3[%c0_27, %c0_28, %c20] : memref<1x8x512xbf16, #tpu.memory_space<vmem>>, vector<1x8x384xbf16>
    %30 = vector.shape_cast %29 : vector<1x8x384xbf16> to vector<8x384xbf16>
    %c5 = arith.constant 5 : index
    %c0_29 = arith.constant 0 : index
    %c0_30 = arith.constant 0 : index
    %31 = vector.load %arg1[%c5, %c0_29, %c0_30] : memref<9x8x8xbf16, #tpu.memory_space<vmem>>, vector<1x8x8xbf16>
    %32 = vector.shape_cast %31 : vector<1x8x8xbf16> to vector<8x8xbf16>
    %cst_31 = arith.constant dense<0.000000e+00> : vector<8x384xf32>
    %33 = tpu.matmul %32, %30, %cst_31 {dimension_numbers = #tpu.dot_dimension_numbers<[1], [0], [0], [1], [0, 0, 1, 1], [], []>} : vector<8x8xbf16>, vector<8x384xbf16>, vector<8x384xf32> -> vector<8x384xf32>
    %34 = arith.addf %28, %33 : vector<8x384xf32>
    %c0_32 = arith.constant 0 : index
    %c0_33 = arith.constant 0 : index
    %c36 = arith.constant 36 : index
    %35 = vector.load %arg3[%c0_32, %c0_33, %c36] : memref<1x8x512xbf16, #tpu.memory_space<vmem>>, vector<1x8x384xbf16>
    %36 = vector.shape_cast %35 : vector<1x8x384xbf16> to vector<8x384xbf16>
    %c6 = arith.constant 6 : index
    %c0_34 = arith.constant 0 : index
    %c0_35 = arith.constant 0 : index
    %37 = vector.load %arg1[%c6, %c0_34, %c0_35] : memref<9x8x8xbf16, #tpu.memory_space<vmem>>, vector<1x8x8xbf16>
    %38 = vector.shape_cast %37 : vector<1x8x8xbf16> to vector<8x8xbf16>
    %cst_36 = arith.constant dense<0.000000e+00> : vector<8x384xf32>
    %39 = tpu.matmul %38, %36, %cst_36 {dimension_numbers = #tpu.dot_dimension_numbers<[1], [0], [0], [1], [0, 0, 1, 1], [], []>} : vector<8x8xbf16>, vector<8x384xbf16>, vector<8x384xf32> -> vector<8x384xf32>
    %40 = arith.addf %34, %39 : vector<8x384xf32>
    %c0_37 = arith.constant 0 : index
    %c0_38 = arith.constant 0 : index
    %c37 = arith.constant 37 : index
    %41 = vector.load %arg3[%c0_37, %c0_38, %c37] : memref<1x8x512xbf16, #tpu.memory_space<vmem>>, vector<1x8x384xbf16>
    %42 = vector.shape_cast %41 : vector<1x8x384xbf16> to vector<8x384xbf16>
    %c7 = arith.constant 7 : index
    %c0_39 = arith.constant 0 : index
    %c0_40 = arith.constant 0 : index
    %43 = vector.load %arg1[%c7, %c0_39, %c0_40] : memref<9x8x8xbf16, #tpu.memory_space<vmem>>, vector<1x8x8xbf16>
    %44 = vector.shape_cast %43 : vector<1x8x8xbf16> to vector<8x8xbf16>
    %cst_41 = arith.constant dense<0.000000e+00> : vector<8x384xf32>
    %45 = tpu.matmul %44, %42, %cst_41 {dimension_numbers = #tpu.dot_dimension_numbers<[1], [0], [0], [1], [0, 0, 1, 1], [], []>} : vector<8x8xbf16>, vector<8x384xbf16>, vector<8x384xf32> -> vector<8x384xf32>
    %46 = arith.addf %40, %45 : vector<8x384xf32>
    %c0_42 = arith.constant 0 : index
    %c0_43 = arith.constant 0 : index
    %c38 = arith.constant 38 : index
    %47 = vector.load %arg3[%c0_42, %c0_43, %c38] : memref<1x8x512xbf16, #tpu.memory_space<vmem>>, vector<1x8x384xbf16>
    %48 = vector.shape_cast %47 : vector<1x8x384xbf16> to vector<8x384xbf16>
    %c8 = arith.constant 8 : index
    %c0_44 = arith.constant 0 : index
    %c0_45 = arith.constant 0 : index
    %49 = vector.load %arg1[%c8, %c0_44, %c0_45] : memref<9x8x8xbf16, #tpu.memory_space<vmem>>, vector<1x8x8xbf16>
    %50 = vector.shape_cast %49 : vector<1x8x8xbf16> to vector<8x8xbf16>
    %cst_46 = arith.constant dense<0.000000e+00> : vector<8x384xf32>
    %51 = tpu.matmul %50, %48, %cst_46 {dimension_numbers = #tpu.dot_dimension_numbers<[1], [0], [0], [1], [0, 0, 1, 1], [], []>} : vector<8x8xbf16>, vector<8x384xbf16>, vector<8x384xf32> -> vector<8x384xf32>
    %52 = arith.addf %46, %51 : vector<8x384xf32>
    %c0_47 = arith.constant 0 : index
    %c0_48 = arith.constant 0 : index
    %53 = vector.load %arg2[%c0_47, %c0_48] : memref<8x1xf32, #tpu.memory_space<vmem>>, vector<8x1xf32>
    %54 = vector.broadcast %53 : vector<8x1xf32> to vector<8x384xf32>
    %55 = arith.addf %52, %54 : vector<8x384xf32>
    %c0_49 = arith.constant 0 : index
    %c0_50 = arith.constant 0 : index
    %c0_51 = arith.constant 0 : index
    %56 = vector.load %arg4[%c0_49, %c0_50, %c0_51] : memref<1x8x384xf32, #tpu.memory_space<vmem>>, vector<1x8x384xf32>
    %57 = vector.shape_cast %56 : vector<1x8x384xf32> to vector<8x384xf32>
    %58 = vector.shape_cast %55 : vector<8x384xf32> to vector<1x8x384xf32>
    tpu.vector_store %arg4[%c0_49, %c0_50, %c0_51], %58 {strides = array<i32>} : memref<1x8x384xf32, #tpu.memory_space<vmem>>, vector<1x8x384xf32>,
    return
  }
  func.func @transform_0(%arg0: i32) -> (i32, i32, i32) {
    %c0_i32 = arith.constant 0 : i32
    %c0_i32_0 = arith.constant 0 : i32
    %c0_i32_1 = arith.constant 0 : i32
    %c0_i32_2 = arith.constant 0 : i32
    return %c0_i32, %c0_i32_0, %c0_i32_1 : i32, i32, i32
  }
  func.func @transform_1(%arg0: i32) -> (i32, i32) {
    %c0_i32 = arith.constant 0 : i32
    %c0_i32_0 = arith.constant 0 : i32
    %c0_i32_1 = arith.constant 0 : i32
    return %c0_i32, %c0_i32_0 : i32, i32
  }
  func.func @transform_2(%arg0: i32) -> (i32, i32, i32) {
    %c0_i32 = arith.constant 0 : i32
    %c0_i32_0 = arith.constant 0 : i32
    %c0_i32_1 = arith.constant 0 : i32
    return %arg0, %c0_i32, %c0_i32_0 : i32, i32, i32
  }
  func.func @transform_3(%arg0: i32) -> (i32, i32, i32) {
    %c0_i32 = arith.constant 0 : i32
    %c0_i32_0 = arith.constant 0 : i32
    %c0_i32_1 = arith.constant 0 : i32
    return %arg0, %c0_i32, %c0_i32_0 : i32, i32, i32
  }
}

</mosaic_0001>

<bundles_post_ra>
// kernel: sn_conv2d_forward.1
= control target key start
LH: loop header
LB: loop body
LE: loop exit
PB: predicated region body
PF: predicated region fallthrough
CT: control target
= control target key end

     0   :  { %8 = vsyncpa [#allocation3], 0  ;;  %s2066_s0 = inlined_call_operand.hbm [shape: bf16[9,8,8], index: 0, kind: input, shape index: {}]   ;;  %s2067_s1 = inlined_call_operand.hbm [shape: f32[8,1], index: 1, kind: input, shape index: {}]   ;;  %s2068_s2 = inlined_call_operand.hbm [shape: bf16[2,8,512], index: 2, kind: input, shape index: {}]   ;;  %s2069_s3 = inlined_call_operand.hbm [shape: f32[2,8,384], index: 3, kind: output, shape index: {}]  }
   0x1   :  { %9 = vsyncpa [#allocation6], 0 }
   0x2   :  { %10 = vsyncpa [#allocation4], 0 }
   0x3   :  { %12 = vsyncpa [#allocation4 + $0x1], 0  ;;  %s1733_s12 = smov 0   ;;  %s1735_s13 = smov 0  }
   0x4   :  { %s1737_s14 = smov 0   ;;  %s1739_s15 = smov 0  }
   0x5 LB: > { %s1754_s16 = sadd.s32 4294967295, %s1694_s15   ;;  %s1324_s17 = sadd.s32 4294967294, %s1694_s15   ;;  %s1694_s15 = sphi %s1739_s15, %s2091_s15   ;;  %s1690_s14 = sphi %s1737_s14, %s2090_s14   ;;  %s1686_s13 = sphi %s1735_s13, %s2089_s13   ;;  %s1682_s12 = sphi %s1733_s12, %s2088_s12  }
   0x6   : > { %p80_p0 = scmp.ne.s32.totalorder %s1686_s13, %s1682_s12  ;;  %p2070_p1 = scmp.eq.s32.totalorder %s1754_s16, 0 }
   0x7   : > { %p110_p3 = scmp.eq.s32.totalorder %s1324_s17, 1  ;;  %p1325_p5 = scmp.ge.s32.totalorder %s1694_s15, 1 }
   0x8   : > { %p1763_p4 = por %p2070_p1, %p80_p0  ;;  %p117_p7 = scmp.lt.s32.totalorder %s1694_s15, 3 }
   0x9   : > { %p1768_p6 = por %p110_p3, %p80_p0  ;;  %s1696_s21 = smov [#allocation2]  }
   0xa   : > { %s2073_s18 = scalar_select %p1763_p4, 1, 0 }
   0xb   : > { %s2074_s19 = scalar_select %p1768_p6, 1, 0 }
   0xc   : > { %p1773_p8 = pnand %p1325_p5, %p117_p7  ;;  %s129_s22 = sshll.u32 %s1696_s21, 4  ;;  %s1777_s22 = int_to_ptr.vmem [resolvable:$true] %s129_s22 }
   0xd   : > { %s1697_s24 = smov [#allocation5]   ;;  %s1534_s28 = scalar_lea.hbm %s2066_s0, 576 }
   0xe   : > { %p1460_p9 = pneg %p1773_p8  ;;  %s143_s25 = sshll.u32 %s1697_s24, 4  ;;  %s1788_s25 = int_to_ptr.vmem [resolvable:$true] %s143_s25 }
   0xf   : > { %p1535_p12 = scmp.ne.s32.totalorder %s2066_s0, %s1534_s28  ;;  %p1541_p5 = scmp.lt.u32.totalorder %s1534_s28, %s2066_s0 }
  0x10   : > { %p1784_p11 = pnand %p1460_p9, %p2070_p1 }
  0x12   : > { %p1536_p13 = pneg %p1784_p11 }
  0x14   : > { %p1537_p0 = pnand %p1536_p13, %p1535_p12 }
  0x16   : > { %p1538_p3 = pneg %p1537_p0 }
  0x18   : > { %p1543_p7 = pnand %p1541_p5, %p1538_p3 }
  0x1a   : > { %1546 = shalt.err (!%p1543_p7)
}
  0x1b   : > { %s1547_s6 = scalar_lea.vmem %s1777_s22, 576  ;;  %p1555_p2 = scmp.lt.s32.totalorder %s1777_s22, %s1777_s22 }
  0x1c   : > { %p1548_p9 = scmp.ne.s32.totalorder %s1777_s22, %s1547_s6  ;;  %p1556_p12 = scmp.lt.s32.totalorder %s1547_s6, %s1547_s6 }
  0x1e   : > { %p1550_p10 = pnand %p1548_p9, %p1536_p13  ;;  %p1557_p0 = por %p1556_p12, %p1555_p2 }
  0x20   : > { %p1551_p1 = pneg %p1550_p10 }
  0x22   : > { %p1558_p6 = pnand %p1557_p0, %p1551_p1 }
  0x24   : > { %1561 = shalt.err (!%p1558_p6)
}
  0x25   : > { %s1698_s7 = smov 64   ;;  %s1699_s8 = smov 4  }
  0x26   : > { %1463 = dma.hbm_to_vmem [thread:$0]  (!%p1784_p11), %s2066_s0, 576, %s1777_s22, [#allocation3], %s1698_s7, %s1698_s7, %s1699_s8  }
  0x27   : > { %s1562_s21 = scalar_lea.hbm %s2067_s1, 128 }
  0x28   : > { %p1563_p2 = scmp.ne.s32.totalorder %s2067_s1, %s1562_s21  ;;  %p1569_p10 = scmp.lt.u32.totalorder %s1562_s21, %s2067_s1 }
  0x2a   : > { %p1565_p1 = pnand %p1563_p2, %p1536_p13 }
  0x2c   : > { %p1566_p6 = pneg %p1565_p1 }
  0x2e   : > { %p1571_p3 = pnand %p1569_p10, %p1566_p6 }
  0x30   : > { %1574 = shalt.err (!%p1571_p3)
}
  0x31   : > { %s1575_s22 = scalar_lea.vmem %s1788_s25, 128  ;;  %p1583_p12 = scmp.lt.s32.totalorder %s1788_s25, %s1788_s25 }
  0x32   : > { %p1576_p5 = scmp.ne.s32.totalorder %s1788_s25, %s1575_s22  ;;  %p1584_p0 = scmp.lt.s32.totalorder %s1575_s22, %s1575_s22 }
  0x34   : > { %p1578_p7 = pnand %p1576_p5, %p1536_p13  ;;  %p1585_p2 = por %p1584_p0, %p1583_p12 }
  0x36   : > { %p1579_p9 = pneg %p1578_p7 }
  0x38   : > { %p1586_p1 = pnand %p1585_p2, %p1579_p9 }
  0x3a   : > { %1589 = shalt.err (!%p1586_p1)
}
  0x3b   : > { %1466 = dma.hbm_to_vmem [thread:$0]  (!%p1784_p11), %s2067_s1, 128, %s1788_s25, [#allocation6]  }
  0x3c   : > { %s1843_s4 = sadd.s32 1, %s1694_s15   ;;  %s67_s23 = sadd.s32 1, %s1690_s14 }
  0x3d   : > { %s64_s5 = ssub.s32 %s1694_s15, %s1843_s4  ;;  %p74_p13 = scmp.ne.s32.totalorder %s1690_s14, %s1686_s13 }
  0x3e   : > { %p65_p6 = scmp.eq.s32.totalorder %s64_s5, 0  ;;  %p75_p10 = scmp.eq.s32.totalorder %s1694_s15, 0 }
  0x3f   : > { %p2077_p3 = scmp.eq.s32.totalorder %s1754_s16, 1  ;;  %p1477_p7 = scmp.lt.s32.totalorder %s1694_s15, 2 }
  0x40   : > { %s1859_s7 = scalar_select %p65_p6, %s1690_s14, %s67_s23  }
  0x41   : > { %p1853_p5 = por %p2077_p3, %p74_p13  ;;  %p76_p9 = por %p75_p10, %p74_p13 }
  0x42   : > { %s154_s8 = sand.u32 1, %s1694_s15   ;;  %s156_s9 = sand.u32 1, %s1690_s14  }
  0x43   : > { %s2078_s6 = scalar_select %p1853_p5, 1, 0 }
  0x44   : > { %s1329_s25 = sshll.u32 %s156_s9, 4  ;;  %s1373_s10 = sshll.u32 %s1694_s15, 8 }
  0x45   : > { %s1867_s21 = scalar_lea.hbm %s2068_s2, %s1373_s10  ;;  %s158_s24 = scalar_lea.vmem [#allocation7], %s1329_s25 }
  0x46   : > { %s166_s26 = sshll.u32 %s158_s24, 4  ;;  %p1869_p11 = pnand %p1477_p7, %p76_p9  ;;  %s1873_s26 = int_to_ptr.vmem [resolvable:$true] %s166_s26 }
  0x47   : > { %s155_s28 = scalar_lea.sflag [#allocation3], %s154_s8  ;;  %s1590_s22 = scalar_lea.hbm %s1867_s21, 256 }
  0x48   : > { %p1591_p12 = scmp.ne.s32.totalorder %s1867_s21, %s1590_s22  ;;  %p1592_p0 = pneg %p1869_p11 }
  0x49   : > { %s1595_s23 = scalar_lea.hbm %s2068_s2, 512  ;;  %p1596_p13 = scmp.lt.u32.totalorder %s1867_s21, %s2068_s2 }
  0x4a   : > { %p1593_p2 = pnand %p1592_p0, %p1591_p12  ;;  %p1597_p6 = scmp.lt.u32.totalorder %s1595_s23, %s1590_s22 }
  0x4b   : > { %p1599_p3 = scmp.lt.u32.totalorder %s1590_s22, %s1867_s21 }
  0x4c   : > { %p1594_p1 = pneg %p1593_p2  ;;  %p1598_p10 = por %p1597_p6, %p1596_p13 }
  0x4e   : > { %p1600_p7 = por %p1599_p3, %p1598_p10 }
  0x50   : > { %p1601_p9 = pnand %p1600_p7, %p1594_p1 }
  0x52   : > { %1604 = shalt.err (!%p1601_p9)
}
  0x53   : > { %s1605_s8 = scalar_lea.vmem %s1873_s26, 256  ;;  %s1700_s25 = smov [#allocation7]  }
  0x54   : > { %p1606_p12 = scmp.ne.s32.totalorder %s1873_s26, %s1605_s8  ;;  %s1610_s10 = sshll.u32 %s1700_s25, 4  ;;  %s1611_s10 = int_to_ptr.vmem [resolvable:$false] %s1610_s10 }
  0x55   : > { %s1612_s11 = scalar_lea.vmem %s1611_s10, 512  ;;  %p1613_p4 = scmp.lt.s32.totalorder %s1873_s26, %s1611_s10 }
  0x56   : > { %p1608_p2 = pnand %p1606_p12, %p1592_p0  ;;  %p1614_p13 = scmp.lt.s32.totalorder %s1612_s11, %s1605_s8 }
  0x58   : > { %p1609_p5 = pneg %p1608_p2  ;;  %p1615_p6 = por %p1614_p13, %p1613_p4 }
  0x5a   : > { %p1616_p10 = pnand %p1615_p6, %p1609_p5 }
  0x5c   : > { %1619 = shalt.err (!%p1616_p10)
}
  0x5d   : > { %1470 = dma.hbm_to_vmem [thread:$0]  (!%p1869_p11), %s1867_s21, 256, %s1873_s26, %s155_s28  }
  0x5e   : > { %175 = sbr.rel (%p1773_p8) target bundleno = 532 (0x214), region = 32  ;;  %p2080_p0 = scmp.eq.s32.totalorder (!%p1773_p8), %s1754_s16, 0 }
  0x65   : > { %1665 = dma.done.wait (%p2080_p0), [#allocation3], 576   ;;  %p2081_p1 = pmov %p2080_p0 }
  0x66   : > { %p2082_p3 = pmov %p2080_p0 }
  0x67   : > { %1667 = vsyncadd (%p2081_p1), [#allocation3], 4294966720 }
  0x68   : > { %1669 = dma.done.wait (%p2082_p3), [#allocation6], 128   ;;  %p2083_p4 = pmov %p2080_p0 }
  0x69   : > { %s185_s17 = sand.u32 1, %s1754_s16   ;;  %s1912_s21 = sand.u32 1, %s1686_s13  }
  0x6a   : > { %1671 = vsyncadd (%p2083_p4), [#allocation6], 4294967168  ;;  %s1335_s20 = sshll.u32 %s1912_s21, 4  ;;  %s186_s24 = scalar_lea.sflag [#allocation3], %s185_s17 }
  0x6b   : > { %s1915_s26 = scalar_lea.vmem [#allocation7], %s1335_s20  ;;  %p2084_p8 = scmp.ne.s32.totalorder %s2073_s18, 0 }
  0x6d   : > { %1673 = dma.done.wait (%p2084_p8), %s186_s24, 256  }
  0x6e   : > { %1675 = vsyncadd (%p2084_p8), %s186_s24, 4294967040  ;;  %v1701_v0 = vmov 0.0   ;;  %v1702_v1 = vmov 0   ;;  %vm1703_vm0 = vmmov 0   ;;  %v217_v2 = vld [vmem:[%s1915_s26 + $0x8] sm:$0xff]  ;;  %v216_v3 = vld [vmem:[%s1915_s26] sm:$0xff] }
  0x6f   : > { %1392 = vmatprep.subr.bf16.mxu1 %v1701_v0  ;;  %288 = vmatprep.mubr.bf16.mxu0 %v1702_v1  ;;  %v1338_v4 = vcombine.low %v217_v2, %v217_v2  ;;  %v1928_v5 = vcombine.low %v216_v3, %v216_v3  ;;  %s1704_s18 = smov 127   ;;  %v1339_v6 = vcombine.high %v217_v2, %v217_v2  ;;  %s1705_s27 = smov 126   ;;  %v1208_v8 = vld [vmem:[#allocation5] sm:$0xff]  ;;  %vm238_vm1 = vcmask 1039360   ;;  %v215_v29 = vld [vmem:[#allocation2] sm:$0xf] }
  0x70   : > { %1394 = vmatprep.mubr.msk.bf16.mxu1 %vm1703_vm0, %v1701_v0  ;;  %1528 = vset.pattern.permute.xlu0 %v1702_v1  ;;  %v1337_v7 = vcombine.high %v216_v3, %v216_v3  ;;  %s1706_s28 = smov 110   ;;  %s1707_s22 = smov 109   ;;  %vm246_vm2 = vcmask 1043456   ;;  %v1533_v13 = vld [vmem:[%s1915_s26 + $0x8] ss:$0 sps:$4 sm:$0xff]   ;;  %vm242_vm3 = vcmask 64512  }
  0x71   : > { %234 = vrot.lane.b32.xlu1 %v1338_v4, %s1704_s18  ;;  %230 = vrot.lane.b32.xlu0 %v1928_v5, %s1704_s18  ;;  %s1708_s29 = smov 108   ;;  %s1709_s30 = smov 92   ;;  %v219_v19 = vld [vmem:[#allocation2 + $0x4] sm:$0xf]  ;;  %v349_v21 = vsel %vm246_vm2, %v1928_v5, 0  ;;  %v355_v23 = vsel %vm246_vm2, %v1533_v13, 0 }
  0x72   : > { %s1710_s23 = smov 91   ;;  %s1711_s5 = smov 90   ;;  %vm448_vm4 = vcmask 1031168   ;;  %vm558_vm5 = vcmask 900096   ;;  %v439_v39 = vld [vmem:[#allocation2 + $0x8] sm:$0xf] }
  0x73   : > { %vm668_vm6 = vcmask 891904   ;;  %v549_v49 = vld [vmem:[#allocation2 + $0xc] sm:$0xf]  ;;  %vm778_vm7 = vcmask 883712   ;;  %v659_v59 = vld [vmem:[#allocation2 + $0x10] sm:$0xf] }
  0x74   : > { %vm888_vm8 = vcmask 752640   ;;  %vm998_vm9 = vcmask 744448   ;;  %vm1108_vm10 = vcmask 736256   ;;  %s1446_s9 = smul.u32 24, %s1912_s21  ;;  %s1221_s20 = scalar_lea.sflag [#allocation4], %s1912_s21 }
  0x75   : > { %236 = vrot.lane.b32.xlu1 %v1339_v6, %s1704_s18  ;;  %232 = vrot.lane.b32.xlu0 %v1337_v7, %s1704_s18  ;;  %s1447_s8 = smul.u32 384, %s1754_s16  ;;  %p2085_p11 = scmp.ne.s32.totalorder %s2078_s6, 0 }
  0x76   : > { %s211_s25 = scalar_lea.vmem [#allocation8], %s1446_s9  ;;  %s1712_s26 = smov [#allocation8]  }
  0x77   : > { %s1235_s10 = sshll.u32 %s211_s25, 4  ;;  %s2022_s16 = scalar_lea.hbm %s2069_s3, %s1447_s8  ;;  %s2024_s10 = int_to_ptr.vmem [resolvable:$true] %s1235_s10 }
  0x78   : > { %s1620_s24 = scalar_lea.vmem %s2024_s10, 384  ;;  %s1624_s18 = sshll.u32 %s1712_s26, 4  ;;  %s1625_s18 = int_to_ptr.vmem [resolvable:$false] %s1624_s18 }
  0x79   : > { %440 = vrot.lane.b32.xlu0 %v1928_v5, %s1705_s27  ;;  %442 = vrot.lane.b32.xlu1 %v1337_v7, %s1705_s27  ;;  %p1621_p5 = scmp.ne.s32.totalorder %s2024_s10, %s1620_s24  ;;  %p1627_p12 = scmp.lt.s32.totalorder %s2024_s10, %s1625_s18 }
  0x7b   : > { %p1622_p7 = pnand %p1621_p5, %p2085_p11 }
  0x7d   : > { %444 = vrot.lane.b32.xlu0 %v1338_v4, %s1705_s27  ;;  %446 = vrot.lane.b32.xlu1 %v1339_v6, %s1705_s27  ;;  %p1623_p9 = pneg %p1622_p7  ;;  %s1626_s27 = scalar_lea.vmem %s1625_s18, 768 }
  0x7e   : > { %p1628_p2 = scmp.lt.s32.totalorder %s1626_s27, %s1620_s24 }
  0x80   : > { %p1629_p13 = por %p1628_p2, %p1627_p12 }
  0x81   : > { %550 = vrot.lane.b32.xlu0 %v1928_v5, %s1706_s28  ;;  %552 = vrot.lane.b32.xlu1 %v1337_v7, %s1706_s28 }
  0x82   : > { %p1630_p6 = pnand %p1629_p13, %p1623_p9 }
  0x85   : > { %554 = vrot.lane.b32.xlu0 %v1338_v4, %s1706_s28  ;;  %556 = vrot.lane.b32.xlu1 %v1339_v6, %s1706_s28 }
  0x89   : > { %660 = vrot.lane.b32.xlu0 %v1928_v5, %s1707_s22  ;;  %662 = vrot.lane.b32.xlu1 %v1337_v7, %s1707_s22 }
  0x8d   : > { %664 = vrot.lane.b32.xlu0 %v1338_v4, %s1707_s22  ;;  %666 = vrot.lane.b32.xlu1 %v1339_v6, %s1707_s22 }
  0x91   : > { %770 = vrot.lane.b32.xlu0 %v1928_v5, %s1708_s29  ;;  %772 = vrot.lane.b32.xlu1 %v1337_v7, %s1708_s29 }
  0x95   : > { %774 = vrot.lane.b32.xlu0 %v1338_v4, %s1708_s29  ;;  %776 = vrot.lane.b32.xlu1 %v1339_v6, %s1708_s29 }
  0x99   : > { %880 = vrot.lane.b32.xlu0 %v1928_v5, %s1709_s30  ;;  %882 = vrot.lane.b32.xlu1 %v1337_v7, %s1709_s30 }
  0x9d   : > { %884 = vrot.lane.b32.xlu0 %v1338_v4, %s1709_s30  ;;  %886 = vrot.lane.b32.xlu1 %v1339_v6, %s1709_s30 }
  0xa1   : > { %990 = vrot.lane.b32.xlu0 %v1928_v5, %s1710_s23  ;;  %992 = vrot.lane.b32.xlu1 %v1337_v7, %s1710_s23 }
  0xa5   : > { %994 = vrot.lane.b32.xlu0 %v1338_v4, %s1710_s23  ;;  %996 = vrot.lane.b32.xlu1 %v1339_v6, %s1710_s23 }
  0xa9   : > { %1100 = vrot.lane.b32.xlu0 %v1928_v5, %s1711_s5  ;;  %1102 = vrot.lane.b32.xlu1 %v1337_v7, %s1711_s5 }
  0xad   : > { %1104 = vrot.lane.b32.xlu0 %v1338_v4, %s1711_s5  ;;  %1106 = vrot.lane.b32.xlu1 %v1339_v6, %s1711_s5 }
  0xb1   : > { %1211 = vperm.xlu0 %1528, %v1208_v8  }
  0xe3   : > { %v235_v9 = vpop.permute.xlu1 %234  ;;  %v231_v10 = vpop.permute.xlu0 %230 }
  0xe7   : > { %v237_v11 = vpop.permute.xlu1 %236  ;;  %v233_v12 = vpop.permute.xlu0 %232 }
  0xe8   : > { %v240_v14 = vsel %vm238_vm1, %v233_v12, %v235_v9  ;;  %v239_v15 = vsel %vm238_vm1, %v231_v10, %v233_v12  ;;  %v241_v16 = vsel %vm238_vm1, %v235_v9, %v237_v11 }
  0xe9   : > { %1340 = vmatprep.subr.msk.bf16.mxu0 %vm246_vm2, %v240_v14  ;;  %v248_v17 = vsel %vm246_vm2, %v239_v15, 0  ;;  %v254_v18 = vsel %vm246_vm2, %v241_v16, 0 }
  0xea   : > { %257 = vmatpush1.bf16.msra.mxu0 %v248_v17  ;;  %1393 = vmatpush3.bf16.msra.mxu1 %v254_v18  ;;  %v879_v17 = vld [vmem:[#allocation2 + $0x18] sm:$0xf] }
  0xeb   : > { %v441_v20 = vpop.permute.xlu0 %440  ;;  %1346 = vmatprep.subr.msk.bf16.mxu0 %vm246_vm2, %v1337_v7  ;;  %1398 = vmatprep.subr.bf16.mxu1 %v1701_v0  ;;  %v443_v22 = vpop.permute.xlu1 %442  ;;  %v769_v7 = vld [vmem:[#allocation2 + $0x14] sm:$0xf] }
  0xec   : > { %v449_v26 = vsel %vm448_vm4, %v441_v20, %v443_v22 }
  0xed   : > { %1341 = vmatmul.mubr.msk.bf16.vlgmr.msra.gmra.mrb[0].mxu0 %vm242_vm3, %v219_v19  ;;  %1395 = vmatmul.mubr.msk.bf16.vlgmr.msra.gmra.mrb[0].mxu1 %vm242_vm3, %v219_v19  ;;  %v456_v30 = vsel %vm246_vm2, %v449_v26, 0 }
  0xee   : > { %358 = vmatpush1.bf16.msra.mxu0 %v349_v21  ;;  %1399 = vmatpush3.bf16.msra.mxu1 %v355_v23 }
  0xef   : > { %v445_v24 = vpop.permute.xlu0 %444  ;;  %v447_v25 = vpop.permute.xlu1 %446  ;;  %389 = vmatprep.mubr.bf16.mxu0 %v1702_v1  ;;  %1400 = vmatprep.mubr.msk.bf16.mxu1 %vm1703_vm0, %v1701_v0 }
  0xf0   : > { %v450_v27 = vsel %vm448_vm4, %v443_v22, %v445_v24  ;;  %v451_v28 = vsel %vm448_vm4, %v445_v24, %v447_v25  ;;  %1404 = vmatprep.subr.bf16.mxu1 %v1701_v0 }
  0xf1   : > { %1349 = vmatprep.subr.msk.bf16.mxu0 %vm246_vm2, %v450_v27  ;;  %v462_v31 = vsel %vm246_vm2, %v451_v28, 0  ;;  %v989_v27 = vld [vmem:[#allocation2 + $0x1c] sm:$0xf] }
  0xf3   : > { %v551_v32 = vpop.permute.xlu0 %550  ;;  %v553_v33 = vpop.permute.xlu1 %552 }
  0xf4   : > { %v559_v36 = vsel %vm558_vm5, %v551_v32, %v553_v33 }
  0xf5   : > { %1347 = vmatmul.mubr.msk.bf16.vlgmr.msra.gmra.mrb[4].mxu0 %vm242_vm3, %v215_v29  ;;  %1401 = vmatmul.mubr.msk.bf16.vlgmr.msra.gmra.mrb[4].mxu1 %vm242_vm3, %v215_v29  ;;  %v566_v40 = vsel %vm246_vm2, %v559_v36, 0 }
  0xf6   : > { %465 = vmatpush1.bf16.msra.mxu0 %v456_v30  ;;  %1405 = vmatpush3.bf16.msra.mxu1 %v462_v31  ;;  %v1099_v30 = vld [vmem:[#allocation2 + $0x20] sm:$0xf] }
  0xf7   : > { %v555_v34 = vpop.permute.xlu0 %554  ;;  %v557_v35 = vpop.permute.xlu1 %556  ;;  %496 = vmatprep.mubr.bf16.mxu0 %v1702_v1  ;;  %1406 = vmatprep.mubr.msk.bf16.mxu1 %vm1703_vm0, %v1701_v0 }
  0xf8   : > { %v560_v37 = vsel %vm558_vm5, %v553_v33, %v555_v34  ;;  %v561_v38 = vsel %vm558_vm5, %v555_v34, %v557_v35  ;;  %1410 = vmatprep.subr.bf16.mxu1 %v1701_v0 }
  0xf9   : > { %1352 = vmatprep.subr.msk.bf16.mxu0 %vm246_vm2, %v560_v37  ;;  %v572_v41 = vsel %vm246_vm2, %v561_v38, 0 }
  0xfb   : > { %v661_v42 = vpop.permute.xlu0 %660  ;;  %v663_v43 = vpop.permute.xlu1 %662 }
  0xfc   : > { %v669_v46 = vsel %vm668_vm6, %v661_v42, %v663_v43 }
  0xfd   : > { %1350 = vmatmul.mubr.msk.bf16.vlgmr.msra.gmra.mrb[8].mxu0 %vm242_vm3, %v439_v39  ;;  %1407 = vmatmul.mubr.msk.bf16.vlgmr.msra.gmra.mrb[8].mxu1 %vm242_vm3, %v439_v39  ;;  %v676_v50 = vsel %vm246_vm2, %v669_v46, 0 }
  0xfe   : > { %575 = vmatpush1.bf16.msra.mxu0 %v566_v40  ;;  %1411 = vmatpush3.bf16.msra.mxu1 %v572_v41 }
  0xff   : > { %v665_v44 = vpop.permute.xlu0 %664  ;;  %v667_v45 = vpop.permute.xlu1 %666  ;;  %606 = vmatprep.mubr.bf16.mxu0 %v1702_v1  ;;  %1412 = vmatprep.mubr.msk.bf16.mxu1 %vm1703_vm0, %v1701_v0 }
 0x100   : > { %v670_v47 = vsel %vm668_vm6, %v663_v43, %v665_v44  ;;  %v671_v48 = vsel %vm668_vm6, %v665_v44, %v667_v45  ;;  %1416 = vmatprep.subr.bf16.mxu1 %v1701_v0 }
 0x101   : > { %1355 = vmatprep.subr.msk.bf16.mxu0 %vm246_vm2, %v670_v47  ;;  %v682_v51 = vsel %vm246_vm2, %v671_v48, 0 }
 0x103   : > { %v771_v52 = vpop.permute.xlu0 %770  ;;  %v773_v53 = vpop.permute.xlu1 %772 }
 0x104   : > { %v779_v56 = vsel %vm778_vm7, %v771_v52, %v773_v53 }
 0x105   : > { %1353 = vmatmul.mubr.msk.bf16.vlgmr.msra.gmra.mrb[12].mxu0 %vm242_vm3, %v549_v49  ;;  %1413 = vmatmul.mubr.msk.bf16.vlgmr.msra.gmra.mrb[12].mxu1 %vm242_vm3, %v549_v49  ;;  %v786_v60 = vsel %vm246_vm2, %v779_v56, 0 }
 0x106   : > { %685 = vmatpush1.bf16.msra.mxu0 %v676_v50  ;;  %1417 = vmatpush3.bf16.msra.mxu1 %v682_v51 }
 0x107   : > { %v775_v54 = vpop.permute.xlu0 %774  ;;  %v777_v55 = vpop.permute.xlu1 %776  ;;  %716 = vmatprep.mubr.bf16.mxu0 %v1702_v1  ;;  %1418 = vmatprep.mubr.msk.bf16.mxu1 %vm1703_vm0, %v1701_v0 }
 0x108   : > { %v780_v57 = vsel %vm778_vm7, %v773_v53, %v775_v54  ;;  %v781_v58 = vsel %vm778_vm7, %v775_v54, %v777_v55  ;;  %1422 = vmatprep.subr.bf16.mxu1 %v1701_v0 }
 0x109   : > { %1358 = vmatprep.subr.msk.bf16.mxu0 %vm246_vm2, %v780_v57  ;;  %v792_v61 = vsel %vm246_vm2, %v781_v58, 0 }
 0x10b   : > { %v881_v62 = vpop.permute.xlu0 %880  ;;  %v883_v63 = vpop.permute.xlu1 %882 }
 0x10c   : > { %v889_v4 = vsel %vm888_vm8, %v881_v62, %v883_v63 }
 0x10d   : > { %1356 = vmatmul.mubr.msk.bf16.vlgmr.msra.gmra.mrb[16].mxu0 %vm242_vm3, %v659_v59  ;;  %1419 = vmatmul.mubr.msk.bf16.vlgmr.msra.gmra.mrb[16].mxu1 %vm242_vm3, %v659_v59  ;;  %v896_v8 = vsel %vm246_vm2, %v889_v4, 0 }
 0x10e   : > { %795 = vmatpush1.bf16.msra.mxu0 %v786_v60  ;;  %1423 = vmatpush3.bf16.msra.mxu1 %v792_v61 }
 0x10f   : > { %v885_v2 = vpop.permute.xlu0 %884  ;;  %v887_v3 = vpop.permute.xlu1 %886  ;;  %826 = vmatprep.mubr.bf16.mxu0 %v1702_v1  ;;  %1424 = vmatprep.mubr.msk.bf16.mxu1 %vm1703_vm0, %v1701_v0 }
 0x110   : > { %v890_v5 = vsel %vm888_vm8, %v883_v63, %v885_v2  ;;  %v891_v6 = vsel %vm888_vm8, %v885_v2, %v887_v3  ;;  %1428 = vmatprep.subr.bf16.mxu1 %v1701_v0 }
 0x111   : > { %1361 = vmatprep.subr.msk.bf16.mxu0 %vm246_vm2, %v890_v5  ;;  %v902_v9 = vsel %vm246_vm2, %v891_v6, 0 }
 0x113   : > { %v991_v10 = vpop.permute.xlu0 %990  ;;  %v993_v11 = vpop.permute.xlu1 %992 }
 0x114   : > { %v999_v14 = vsel %vm998_vm9, %v991_v10, %v993_v11 }
 0x115   : > { %1359 = vmatmul.mubr.msk.bf16.vlgmr.msra.gmra.mrb[20].mxu0 %vm242_vm3, %v769_v7  ;;  %1425 = vmatmul.mubr.msk.bf16.vlgmr.msra.gmra.mrb[20].mxu1 %vm242_vm3, %v769_v7  ;;  %v1006_v18 = vsel %vm246_vm2, %v999_v14, 0 }
 0x116   : > { %905 = vmatpush1.bf16.msra.mxu0 %v896_v8  ;;  %1429 = vmatpush3.bf16.msra.mxu1 %v902_v9 }
 0x117   : > { %v995_v12 = vpop.permute.xlu0 %994  ;;  %v997_v13 = vpop.permute.xlu1 %996  ;;  %936 = vmatprep.mubr.bf16.mxu0 %v1702_v1  ;;  %1430 = vmatprep.mubr.msk.bf16.mxu1 %vm1703_vm0, %v1701_v0 }
 0x118   : > { %v1000_v15 = vsel %vm998_vm9, %v993_v11, %v995_v12  ;;  %v1001_v16 = vsel %vm998_vm9, %v995_v12, %v997_v13  ;;  %1434 = vmatprep.subr.bf16.mxu1 %v1701_v0 }
 0x119   : > { %1364 = vmatprep.subr.msk.bf16.mxu0 %vm246_vm2, %v1000_v15  ;;  %v1012_v19 = vsel %vm246_vm2, %v1001_v16, 0 }
 0x11b   : > { %v1101_v20 = vpop.permute.xlu0 %1100  ;;  %v1103_v21 = vpop.permute.xlu1 %1102 }
 0x11c   : > { %v1109_v24 = vsel %vm1108_vm10, %v1101_v20, %v1103_v21 }
 0x11d   : > { %1362 = vmatmul.mubr.msk.bf16.vlgmr.msra.gmra.mrb[24].mxu0 %vm242_vm3, %v879_v17  ;;  %1431 = vmatmul.mubr.msk.bf16.vlgmr.msra.gmra.mrb[24].mxu1 %vm242_vm3, %v879_v17  ;;  %v1116_v28 = vsel %vm246_vm2, %v1109_v24, 0 }
 0x11e   : > { %1015 = vmatpush1.bf16.msra.mxu0 %v1006_v18  ;;  %1435 = vmatpush3.bf16.msra.mxu1 %v1012_v19 }
 0x11f   : > { %v1105_v22 = vpop.permute.xlu0 %1104  ;;  %v1107_v23 = vpop.permute.xlu1 %1106  ;;  %1046 = vmatprep.mubr.bf16.mxu0 %v1702_v1  ;;  %1436 = vmatprep.mubr.msk.bf16.mxu1 %vm1703_vm0, %v1701_v0 }
 0x120   : > { %v1110_v25 = vsel %vm1108_vm10, %v1103_v21, %v1105_v22  ;;  %v1111_v26 = vsel %vm1108_vm10, %v1105_v22, %v1107_v23  ;;  %1440 = vmatprep.subr.bf16.mxu1 %v1701_v0 }
 0x121   : > { %1367 = vmatprep.subr.msk.bf16.mxu0 %vm246_vm2, %v1110_v25  ;;  %v1122_v29 = vsel %vm246_vm2, %v1111_v26, 0 }
 0x125   : > { %1365 = vmatmul.mubr.msk.bf16.vlgmr.msra.gmra.mrb[28].mxu0 %vm242_vm3, %v989_v27  ;;  %1437 = vmatmul.mubr.msk.bf16.vlgmr.msra.gmra.mrb[28].mxu1 %vm242_vm3, %v989_v27 }
 0x126   : > { %1125 = vmatpush1.bf16.msra.mxu0 %v1116_v28  ;;  %1441 = vmatpush3.bf16.msra.mxu1 %v1122_v29 }
 0x127   : > { %1156 = vmatprep.mubr.bf16.mxu0 %v1702_v1  ;;  %1442 = vmatprep.mubr.msk.bf16.mxu1 %vm1703_vm0, %v1701_v0 }
 0x12d   : > { %1368 = vmatmul.mubr.msk.bf16.vlgmr.msra.gmra.mrb[32].mxu0 %vm242_vm3, %v1099_v30  ;;  %1443 = vmatmul.mubr.msk.bf16.vlgmr.msra.gmra.mrb[32].mxu1 %vm242_vm3, %v1099_v30 }
 0x1c0   : > { %v290_v31 = vpop.f32.mrb[0].mxu0  ;;  %v331_v32 = vpop.f32.mrb[0].mxu1 }
 0x1c1   : > { %v292_v33 = vpop.f32.mrb[1].mxu0  ;;  %v1396_v34 = vpop.f32.mrb[1].mxu1 }
 0x1c2   : > { %v294_v35 = vpop.f32.mrb[2].mxu0  ;;  %v334_v36 = vpop.f32.mrb[2].mxu1 }
 0x1c3   : > { %v295_v37 = vpop.f32.mrb[3].mxu0  ;;  %v1397_v38 = vpop.f32.mrb[3].mxu1 }
 0x1c8   : > { %v391_v39 = vpop.f32.mrb[4].mxu0  ;;  %v432_v40 = vpop.f32.mrb[4].mxu1 }
 0x1c9   : > { %v392_v41 = vadd.f32 %v391_v39, %v290_v31  ;;  %v433_v1 = vadd.f32 %v432_v40, %v331_v32  ;;  %v393_v42 = vpop.f32.mrb[5].mxu0  ;;  %v1402_v43 = vpop.f32.mrb[5].mxu1 }
 0x1ca   : > { %v394_v0 = vadd.f32 %v393_v42, %v292_v33  ;;  %v395_v44 = vpop.f32.mrb[6].mxu0  ;;  %v435_v45 = vpop.f32.mrb[6].mxu1 }
 0x1cb   : > { %v396_v46 = vpop.f32.mrb[7].mxu0  ;;  %v1403_v47 = vpop.f32.mrb[7].mxu1 }
 0x1d0   : > { %v498_v48 = vpop.f32.mrb[8].mxu0  ;;  %v539_v49 = vpop.f32.mrb[8].mxu1 }
 0x1d1   : > { %v545_v50 = vadd.f32 %v498_v48, %v392_v41  ;;  %v547_v51 = vadd.f32 %v539_v49, %v433_v1  ;;  %v500_v52 = vpop.f32.mrb[9].mxu0  ;;  %v1408_v53 = vpop.f32.mrb[9].mxu1 }
 0x1d2   : > { %v546_v54 = vadd.f32 %v500_v52, %v394_v0  ;;  %v502_v55 = vpop.f32.mrb[10].mxu0  ;;  %v542_v56 = vpop.f32.mrb[10].mxu1 }
 0x1d3   : > { %v503_v57 = vpop.f32.mrb[11].mxu0  ;;  %v1409_v58 = vpop.f32.mrb[11].mxu1 }
 0x1d8   : > { %v608_v59 = vpop.f32.mrb[12].mxu0  ;;  %v649_v60 = vpop.f32.mrb[12].mxu1 }
 0x1d9   : > { %v655_v61 = vadd.f32 %v608_v59, %v545_v50  ;;  %v657_v62 = vadd.f32 %v649_v60, %v547_v51  ;;  %v610_v63 = vpop.f32.mrb[13].mxu0  ;;  %v1414_v2 = vpop.f32.mrb[13].mxu1 }
 0x1da   : > { %v656_v3 = vadd.f32 %v610_v63, %v546_v54  ;;  %v612_v4 = vpop.f32.mrb[14].mxu0  ;;  %v652_v5 = vpop.f32.mrb[14].mxu1 }
 0x1db   : > { %v613_v6 = vpop.f32.mrb[15].mxu0  ;;  %v1415_v7 = vpop.f32.mrb[15].mxu1 }
 0x1dc   : > { %v1212_v50 = vpop.permute.xlu0 %1211 }
 0x1e0   : > { %v718_v8 = vpop.f32.mrb[16].mxu0  ;;  %v759_v9 = vpop.f32.mrb[16].mxu1 }
 0x1e1   : > { %v765_v10 = vadd.f32 %v718_v8, %v655_v61  ;;  %v767_v11 = vadd.f32 %v759_v9, %v657_v62  ;;  %v720_v12 = vpop.f32.mrb[17].mxu0  ;;  %v1420_v13 = vpop.f32.mrb[17].mxu1 }
 0x1e2   : > { %v766_v14 = vadd.f32 %v720_v12, %v656_v3  ;;  %v722_v15 = vpop.f32.mrb[18].mxu0  ;;  %v762_v16 = vpop.f32.mrb[18].mxu1 }
 0x1e3   : > { %v723_v17 = vpop.f32.mrb[19].mxu0  ;;  %v1421_v18 = vpop.f32.mrb[19].mxu1 }
 0x1e8   : > { %v828_v19 = vpop.f32.mrb[20].mxu0  ;;  %v869_v20 = vpop.f32.mrb[20].mxu1 }
 0x1e9   : > { %v875_v21 = vadd.f32 %v828_v19, %v765_v10  ;;  %v877_v22 = vadd.f32 %v869_v20, %v767_v11  ;;  %v830_v23 = vpop.f32.mrb[21].mxu0  ;;  %v1426_v24 = vpop.f32.mrb[21].mxu1 }
 0x1ea   : > { %v876_v25 = vadd.f32 %v830_v23, %v766_v14  ;;  %v832_v26 = vpop.f32.mrb[22].mxu0  ;;  %v872_v27 = vpop.f32.mrb[22].mxu1 }
 0x1eb   : > { %v833_v28 = vpop.f32.mrb[23].mxu0  ;;  %v1427_v29 = vpop.f32.mrb[23].mxu1 }
 0x1f0   : > { %v938_v30 = vpop.f32.mrb[24].mxu0  ;;  %v979_v31 = vpop.f32.mrb[24].mxu1 }
 0x1f1   : > { %v985_v32 = vadd.f32 %v938_v30, %v875_v21  ;;  %v987_v33 = vadd.f32 %v979_v31, %v877_v22  ;;  %v940_v34 = vpop.f32.mrb[25].mxu0  ;;  %v1432_v35 = vpop.f32.mrb[25].mxu1 }
 0x1f2   : > { %v986_v36 = vadd.f32 %v940_v34, %v876_v25  ;;  %v942_v37 = vpop.f32.mrb[26].mxu0  ;;  %v982_v38 = vpop.f32.mrb[26].mxu1 }
 0x1f3   : > { %v943_v39 = vpop.f32.mrb[27].mxu0  ;;  %v1433_v40 = vpop.f32.mrb[27].mxu1 }
 0x1f8   : > { %v1048_v41 = vpop.f32.mrb[28].mxu0  ;;  %v1089_v1 = vpop.f32.mrb[28].mxu1 }
 0x1f9   : > { %v1095_v42 = vadd.f32 %v1048_v41, %v985_v32  ;;  %v1097_v43 = vadd.f32 %v1089_v1, %v987_v33  ;;  %v1050_v0 = vpop.f32.mrb[29].mxu0  ;;  %v1438_v44 = vpop.f32.mrb[29].mxu1 }
 0x1fa   : > { %v1096_v45 = vadd.f32 %v1050_v0, %v986_v36  ;;  %v1052_v46 = vpop.f32.mrb[30].mxu0  ;;  %v1092_v47 = vpop.f32.mrb[30].mxu1 }
 0x1fb   : > { %v1053_v48 = vpop.f32.mrb[31].mxu0  ;;  %v1439_v49 = vpop.f32.mrb[31].mxu1 }
 0x200   : > { %v1158_v51 = vpop.f32.mrb[32].mxu0  ;;  %v1199_v52 = vpop.f32.mrb[32].mxu1 }
 0x201   : > { %v1205_v53 = vadd.f32 %v1158_v51, %v1095_v42  ;;  %v1207_v54 = vadd.f32 %v1199_v52, %v1097_v43  ;;  %v1160_v55 = vpop.f32.mrb[33].mxu0  ;;  %v1444_v56 = vpop.f32.mrb[33].mxu1 }
 0x202   : > { %v1206_v57 = vadd.f32 %v1160_v55, %v1096_v45  ;;  %v1162_v58 = vpop.f32.mrb[34].mxu0  ;;  %v1202_v59 = vpop.f32.mrb[34].mxu1 }
 0x203   : > { %v1214_v60 = vadd.f32 %v1212_v50, %v1205_v53  ;;  %v1216_v61 = vadd.f32 %v1212_v50, %v1207_v54  ;;  %v1163_v62 = vpop.f32.mrb[35].mxu0  ;;  %v1445_v63 = vpop.f32.mrb[35].mxu1 }
 0x204   : > { %v1215_v2 = vadd.f32 %v1212_v50, %v1206_v57 }
 0x205   : > { %1217 = vst [vmem:[%s211_s25] sm:$0xff] %v1214_v60  ;;  %1219 = vst [vmem:[%s211_s25 + $0x10] sm:$0xff] %v1216_v61 }
 0x206   : > { %1218 = vst [vmem:[%s211_s25 + $0x8] sm:$0xff] %v1215_v2 }
 0x207   : > { %1633 = shalt.err (!%p1630_p6)
}
 0x208   : > { %s1634_s21 = scalar_lea.hbm %s2022_s16, 384  ;;  %s1638_s29 = scalar_lea.hbm %s2069_s3, 768 }
 0x209   : > { %p1635_p10 = scmp.ne.s32.totalorder %s2022_s16, %s1634_s21  ;;  %p1639_p3 = scmp.lt.u32.totalorder %s2022_s16, %s2069_s3 }
 0x20a   : > { %p1640_p4 = scmp.lt.u32.totalorder %s1638_s29, %s1634_s21  ;;  %p1642_p5 = scmp.lt.u32.totalorder %s1634_s21, %s2022_s16 }
 0x20b   : > { %p1636_p0 = pnand %p1635_p10, %p2085_p11 }
 0x20c   : > { %p1641_p8 = por %p1640_p4, %p1639_p3 }
 0x20d   : > { %p1637_p1 = pneg %p1636_p0 }
 0x20e   : > { %p1643_p7 = por %p1642_p5, %p1641_p8 }
 0x210   : > { %p1644_p9 = pnand %p1643_p7, %p1637_p1 }
 0x212   : > { %1647 = shalt.err (!%p1644_p9)
}
 0x213   : > { %1458 = dma.vmem_to_hbm [thread:$0]  (%p2085_p11), %s2024_s10, 384, %s2022_s16, %s1221_s20  }
 0x214 PF: > { %s1247_s5 = sand.u32 1, %s1682_s12   ;;  %p2086_p12 = scmp.ne.s32.totalorder %s2074_s19, 0 }
 0x215   : > { %p2087_p2 = scmp.ge.s32.totalorder %s1694_s15, 2  ;;  %s1248_s9 = scalar_lea.sflag [#allocation4], %s1247_s5 }
 0x217   : > { %p1472_p13 = pnand %p2087_p2, %p2086_p12 }
 0x219   : > { %1677 = dma.done.wait (!%p1472_p13), %s1248_s9, 384  }
 0x21a   : > { %1679 = vsyncadd (!%p1472_p13), %s1248_s9, 4294966912  ;;  %p15_p6 = scmp.ge.s32.totalorder %s1843_s4, 4   ;;  %s2088_s12 = smov %s1686_s13 }
 0x21b   : > { %s2089_s13 = smov %s1690_s14  ;;  %s2090_s14 = smov %s1859_s7 }
 0x21c   : > { %s2091_s15 = smov %s1843_s4  ;;  %17 = sbr.rel (!%p15_p6) target bundleno = 5 (0x5), region = 92 }
 0x223   :  { %1253 = vsyncpa [#allocation3], 1 }
 0x224   :  { %1255 = vsyncpa [#allocation3 + $0x1], 1 }
 0x225   :  { %1256 = vsyncpa [#allocation6], 1 }
 0x226   :  { %1257 = vsyncpa [#allocation4], 1 }
 0x227   :  { %1259 = vsyncpa [#allocation4 + $0x1], 1 }

</bundles_post_ra>
